<compile_context>
chip_gen: v7x
topology: tpu7x:2x2x1
jax: 0.10.0
libtpu: 0.0.40
codegen_flags: <defaults>
</compile_context>

<pallas_src>
import functools

import jax
import jax.numpy as jnp
from jax.experimental import pallas as pl
from jax.experimental.pallas import tpu as pltpu


def _cdiv(a, b):
    return -(-a // b)


def _round_up(x, m):
    return _cdiv(x, m) * m


def _torus_sdf_kernel(center_ref, radii_ref, pts_ref, out_ref):
    # center_ref: SMEM (3,)   radii_ref: SMEM (2,)
    # pts_ref:    VMEM (3, TR, 128)   out_ref: VMEM (TR, 128)
    cx = center_ref[0]
    cy = center_ref[1]
    cz = center_ref[2]
    big_r = radii_ref[0]    # torus major radius
    small_r = radii_ref[1]  # torus minor radius

    dx = pts_ref[0] - cx    # (TR, 128) full-vreg coordinate planes
    dy = pts_ref[1] - cy
    dz = pts_ref[2] - cz

    r_xy = jnp.sqrt(dx * dx + dy * dy) - big_r
    out_ref[...] = jnp.sqrt(r_xy * r_xy + dz * dz) - small_r


def torus_sdf_planar(pts_planar, center, radii, *, tile_rows,
                     allow_input_fusion=True):
    """SDF on planar points.

    pts_planar: (3, R, 128) f32 with R % tile_rows == 0 and tile_rows % 8 == 0;
    point p lives at [:, p // 128, p % 128].  Returns an (R, 128) f32 slab
    (no tail-slice copy); point p's SDF is at [p // 128, p % 128].

    This is the preferred entry point for callers that already hold (or can
    cheaply produce) channel-major points: it involves no layout glue at all.
    """
    _, r_pad, _ = pts_planar.shape
    grid = r_pad // tile_rows
    # Double-buffered (3, TR, 128) input + (TR, 128) output blocks, plus slack
    # for compiler scratch.  >= 32 MiB so tile_rows=4096 also fits v5e's
    # 16 MiB default scoped-VMEM; scales up for e.g. tile_rows=8192 on v7x.
    vmem_limit = max(32 << 20, 4096 * tile_rows + (8 << 20))
    return pl.pallas_call(
        _torus_sdf_kernel,
        out_shape=jax.ShapeDtypeStruct((r_pad, 128), jnp.float32),
        grid=(grid,),
        in_specs=[
            pl.BlockSpec(memory_space=pltpu.MemorySpace.SMEM),       # center (3,)
            pl.BlockSpec(memory_space=pltpu.MemorySpace.SMEM),       # radii  (2,)
            pl.BlockSpec((3, tile_rows, 128), lambda i: (0, i, 0)),  # points
        ],
        out_specs=pl.BlockSpec((tile_rows, 128), lambda i: (i, 0)),
        compiler_params=pltpu.CompilerParams(
            dimension_semantics=("parallel",),
            # Let XLA fold the producer pad/transpose of the points operand
            # into the kernel's input DMAs (no materialized extra HBM pass).
            allow_input_fusion=[False, False, bool(allow_input_fusion)],
            vmem_limit_bytes=int(vmem_limit),
        ),
    )(center.reshape(-1).astype(jnp.float32),
      radii.reshape(-1).astype(jnp.float32),
      pts_planar)


def _choose_row_tiling(rows, tile_rows):
    """Pick (tr, r_pad): tr % 8 == 0, tr <= tile_rows, r_pad % tr == 0.

    Ensures >= 2 (and an even number of) grid steps whenever the input can be
    split, so both v7x TensorCores get balanced work, while keeping the
    zero-padded tail small (at most a few rows per step, never a whole tile).
    """
    steps = _cdiv(rows, tile_rows)          # enough steps to respect tile_rows
    if rows >= 16:
        steps = max(steps, 2)               # >= 2 steps: use both v7x TCs
        if steps % 2:
            steps += 1                      # even steps: balanced split
    tr = _round_up(_cdiv(rows, steps), 8)
    return tr, steps * tr


@functools.partial(jax.jit, static_argnames=("tile_rows", "allow_input_fusion"))
def torus_sdf(points, center, radii, *, tile_rows=4096, allow_input_fusion=True):
    """points: any shape (..., 3); center: (1, 3); radii: (1, 2). Returns (N, 1)."""
    pts = points.reshape(-1, 3).astype(jnp.float32)
    n = pts.shape[0]
    if n == 0:                              # guard degenerate empty input
        return jnp.zeros((0, 1), jnp.float32)

    tile_rows = max(8, _round_up(int(tile_rows), 8))
    rows = _round_up(max(8, _cdiv(n, 128)), 8)
    tr, r_pad = _choose_row_tiling(rows, tile_rows)
    n_pad = r_pad * 128

    # Layout glue: interleaved (N, 3) -> planar (3, r_pad, 128).  With
    # allow_input_fusion above, XLA may fold this pad+transpose into the
    # pallas_call's input reads instead of writing it back to HBM.  Padded
    # tail points are zeros, give finite SDF values, and are sliced off below.
    if n_pad != n:
        pts = jnp.pad(pts, ((0, n_pad - n), (0, 0)))
    pts_planar = pts.T.reshape(3, r_pad, 128)

    out = torus_sdf_planar(pts_planar, center, radii, tile_rows=tr,
                           allow_input_fusion=allow_input_fusion)

    flat = out.reshape(-1)                  # free (row-major contiguous)
    if n_pad != n:
        flat = flat[:n]                     # slice copy only when padded
    return flat.reshape(n, 1)


def torus_sdf_ref(points, center, radii):
    pts = points.reshape(-1, 3)
    diff = pts - center                                   # (N, 3)
    q0 = jnp.linalg.norm(diff[..., :2], axis=-1) - radii[..., 0]
    q = jnp.stack([q0, diff[..., -1]], axis=-1)           # (N, 2)
    return (jnp.linalg.norm(q, axis=-1) - radii[..., 1])[:, None]


if __name__ == "__main__":
    key = jax.random.PRNGKey(0)
    # Small "point cloud": batch=2, 128 points each, 3 coords -> N = 256.
    points = jax.random.normal(key, (2, 128, 3), dtype=jnp.float32) * 2.0

    # Deterministic parameters (shapes from __init__: center (1,3), radii (1,2)).
    center = jnp.array([[0.1, -0.2, 0.3]], dtype=jnp.float32)
    radii = jnp.array([[1.0, 0.25]], dtype=jnp.float32)

    out = torus_sdf(points, center, radii)
    out = jax.block_until_ready(out)

    ref = torus_sdf_ref(points, center, radii)
    assert out.shape == (points.shape[0] * points.shape[1], 1)
    assert jnp.allclose(out, ref, atol=1e-5, rtol=1e-5)

    print("KERNEL_OK")
</pallas_src>

<mosaic_0001>
module attributes {stable_mosaic.version = 11 : i64} {
  func.func @_torus_sdf_kernel(%arg0: i32, %arg1: memref<3xf32, #tpu.memory_space<smem>>, %arg2: memref<2xf32, #tpu.memory_space<smem>>, %arg3: memref<3x8x128xf32, #tpu.memory_space<vmem>>, %arg4: memref<8x128xf32, #tpu.memory_space<vmem>>) attributes {dimension_semantics = [#tpu.dimension_semantics<parallel>], iteration_bounds = array<i64: 1>, scalar_prefetch = 0 : i64, scratch_operands = 0 : i64, tpu.core_type = #tpu.core_type<tc>, window_params = [{transform_indices = @transform_0, window_bounds = array<i64: 3>}, {transform_indices = @transform_1, window_bounds = array<i64: 2>}, {transform_indices = @transform_2, window_bounds = array<i64: 3, 8, 128>}, {transform_indices = @transform_3, window_bounds = array<i64: 8, 128>}]} {
    %c0 = arith.constant 0 : index
    %0 = memref.load %arg1[%c0] : memref<3xf32, #tpu.memory_space<smem>>
    %c1 = arith.constant 1 : index
    %1 = memref.load %arg1[%c1] : memref<3xf32, #tpu.memory_space<smem>>
    %c2 = arith.constant 2 : index
    %2 = memref.load %arg1[%c2] : memref<3xf32, #tpu.memory_space<smem>>
    %c0_0 = arith.constant 0 : index
    %3 = memref.load %arg2[%c0_0] : memref<2xf32, #tpu.memory_space<smem>>
    %c1_1 = arith.constant 1 : index
    %4 = memref.load %arg2[%c1_1] : memref<2xf32, #tpu.memory_space<smem>>
    %c0_2 = arith.constant 0 : index
    %c0_3 = arith.constant 0 : index
    %c0_4 = arith.constant 0 : index
    %5 = vector.load %arg3[%c0_2, %c0_3, %c0_4] : memref<3x8x128xf32, #tpu.memory_space<vmem>>, vector<1x8x128xf32>
    %6 = vector.shape_cast %5 : vector<1x8x128xf32> to vector<8x128xf32>
    %7 = vector.broadcast %0 : f32 to vector<8x128xf32>
    %8 = arith.subf %6, %7 : vector<8x128xf32>
    %c1_5 = arith.constant 1 : index
    %c0_6 = arith.constant 0 : index
    %c0_7 = arith.constant 0 : index
    %9 = vector.load %arg3[%c1_5, %c0_6, %c0_7] : memref<3x8x128xf32, #tpu.memory_space<vmem>>, vector<1x8x128xf32>
    %10 = vector.shape_cast %9 : vector<1x8x128xf32> to vector<8x128xf32>
    %11 = vector.broadcast %1 : f32 to vector<8x128xf32>
    %12 = arith.subf %10, %11 : vector<8x128xf32>
    %c2_8 = arith.constant 2 : index
    %c0_9 = arith.constant 0 : index
    %c0_10 = arith.constant 0 : index
    %13 = vector.load %arg3[%c2_8, %c0_9, %c0_10] : memref<3x8x128xf32, #tpu.memory_space<vmem>>, vector<1x8x128xf32>
    %14 = vector.shape_cast %13 : vector<1x8x128xf32> to vector<8x128xf32>
    %15 = vector.broadcast %2 : f32 to vector<8x128xf32>
    %16 = arith.subf %14, %15 : vector<8x128xf32>
    %17 = arith.mulf %8, %8 : vector<8x128xf32>
    %18 = arith.mulf %12, %12 : vector<8x128xf32>
    %19 = arith.addf %17, %18 : vector<8x128xf32>
    %20 = math.sqrt %19 : vector<8x128xf32>
    %21 = vector.broadcast %3 : f32 to vector<8x128xf32>
    %22 = arith.subf %20, %21 : vector<8x128xf32>
    %23 = arith.mulf %22, %22 : vector<8x128xf32>
    %24 = arith.mulf %16, %16 : vector<8x128xf32>
    %25 = arith.addf %23, %24 : vector<8x128xf32>
    %26 = math.sqrt %25 : vector<8x128xf32>
    %27 = vector.broadcast %4 : f32 to vector<8x128xf32>
    %28 = arith.subf %26, %27 : vector<8x128xf32>
    %c0_11 = arith.constant 0 : index
    %c0_12 = arith.constant 0 : index
    %29 = vector.load %arg4[%c0_11, %c0_12] : memref<8x128xf32, #tpu.memory_space<vmem>>, vector<8x128xf32>
    tpu.vector_store %arg4[%c0_11, %c0_12], %28 {strides = array<i32>} : memref<8x128xf32, #tpu.memory_space<vmem>>, vector<8x128xf32>,
    return
  }
  func.func @transform_0(%arg0: i32) -> i32 {
    %c0_i32 = arith.constant 0 : i32
    %c0_i32_0 = arith.constant 0 : i32
    return %c0_i32 : i32
  }
  func.func @transform_1(%arg0: i32) -> i32 {
    %c0_i32 = arith.constant 0 : i32
    %c0_i32_0 = arith.constant 0 : i32
    return %c0_i32 : i32
  }
  func.func @transform_2(%arg0: i32) -> (i32, i32, i32) {
    %c0_i32 = arith.constant 0 : i32
    %c0_i32_0 = arith.constant 0 : i32
    %c0_i32_1 = arith.constant 0 : i32
    return %c0_i32, %arg0, %c0_i32_0 : i32, i32, i32
  }
  func.func @transform_3(%arg0: i32) -> (i32, i32) {
    %c0_i32 = arith.constant 0 : i32
    %c0_i32_0 = arith.constant 0 : i32
    return %arg0, %c0_i32 : i32, i32
  }
}

</mosaic_0001>

<bundles_post_ra>
// kernel: torus_sdf.2
= control target key start
LH: loop header
LB: loop body
LE: loop exit
PB: predicated region body
PF: predicated region fallthrough
CT: control target
= control target key end

     0   :  { %8 = vsyncpa [#allocation3], 0  ;;  %s178_s0 = inlined_call_operand.vmem [shape: f32[3], index: 0, kind: input, shape index: {}]   ;;  %s179_s1 = inlined_call_operand.vmem [shape: f32[2], index: 1, kind: input, shape index: {}]   ;;  %s180_s2 = inlined_call_operand.vmem [shape: f32[1,3,8,128], index: 2, kind: input, shape index: {}]   ;;  %s181_s3 = inlined_call_operand.vmem [shape: f32[8,128], index: 3, kind: output, shape index: {}]  }
   0x1   :  { %s16_s14 = sshll.u32 %s178_s0, 4  ;;  %s17_s14 = int_to_ptr.vmem [resolvable:$true] %s16_s14 }
   0x2   :  { %9 = vsyncpa [#allocation5], 0  ;;  %s26_s17 = sshll.u32 %s179_s1, 4  ;;  %s110_s18 = scalar_lea.vmem %s17_s14, 16  ;;  %s27_s17 = int_to_ptr.vmem [resolvable:$true] %s26_s17 }
   0x3   :  { %p111_p0 = scmp.ne.s32.totalorder %s17_s14, %s110_s18  ;;  %p115_p1 = scmp.lt.s32.totalorder %s17_s14, %s17_s14 }
   0x4   :  { %p116_p2 = scmp.lt.s32.totalorder %s110_s18, %s110_s18 }
   0x6   :  { %p117_p3 = por %p116_p2, %p115_p1 }
   0x8   :  { %p118_p4 = pnand %p117_p3, %p111_p0 }
   0xa   :  { %121 = shalt.err (!%p118_p4)
}
   0xb   :  { %s138_s19 = smov [#allocation2]   ;;  %s122_s20 = scalar_lea.vmem %s27_s17, 16 }
   0xc   :  { %19 = dma.vmem_to_smem %s17_s14, 16, %s138_s19, [#allocation3]  }
   0xd   :  { %p123_p5 = scmp.ne.s32.totalorder %s27_s17, %s122_s20  ;;  %p127_p6 = scmp.lt.s32.totalorder %s27_s17, %s27_s17 }
   0xe   :  { %p128_p7 = scmp.lt.s32.totalorder %s122_s20, %s122_s20 }
  0x10   :  { %p129_p8 = por %p128_p7, %p127_p6 }
  0x12   :  { %p130_p9 = pnand %p129_p8, %p123_p5 }
  0x14   :  { %133 = shalt.err (!%p130_p9)
}
  0x15   :  { %s139_s0 = smov [#allocation4]  }
  0x16   :  { %29 = dma.vmem_to_smem %s27_s17, 16, %s139_s0, [#allocation5]  }
  0x17   :  { %134 = dma.done.wait [#allocation3], 16  }
  0x18   :  { %135 = vsyncadd [#allocation3], 4294967280 }
  0x19   :  { %136 = dma.done.wait [#allocation5], 16  }
  0x1a   :  { %137 = vsyncadd [#allocation5], 4294967280 }
  0x1b   :  { %38 = sfence }
  0x1c   :  { %s52_s1 = sld [smem:[#allocation2]]  ;;  %s101_s21 = sld [smem:[#allocation2 + $0x1]]  ;;  %v39_v0 = vld [vmem:[%s180_s2] sm:$0xff]  ;;  %v99_v1 = vld [vmem:[%s180_s2 + $0x8] sm:$0xff]  ;;  %v100_v9 = vld [vmem:[%s180_s2 + $0x10] sm:$0xff] }
  0x1d   :  { %s102_s26 = sld [smem:[#allocation2 + $0x2]]  ;;  %s55_s27 = sld [smem:[#allocation4]] }
  0x1e   :  { %s103_s30 = sld [smem:[#allocation4 + $0x1]] }
  0x22   :  { %v58_v2 = vstv %s52_s1  ;;  %v62_v4 = vstv %s101_s21 }
  0x23   :  { %v59_v3 = vsub.f32 %v39_v0, %v58_v2  ;;  %v63_v5 = vsub.f32 %v99_v1, %v62_v4  ;;  %v66_v10 = vstv %s102_s26  ;;  %v78_v15 = vstv %s55_s27 }
  0x24   :  { %v67_v13 = vsub.f32 %v100_v9, %v66_v10  ;;  %v90_v25 = vstv %s103_s30 }
  0x25   :  { %v68_v6 = vmul.f32 %v59_v3, %v59_v3  ;;  %v69_v7 = vmul.f32 %v63_v5, %v63_v5 }
  0x26   :  { %v81_v19 = vmul.f32 %v67_v13, %v67_v13 }
  0x27   :  { %v70_v8 = vadd.f32 %v69_v7, %v68_v6 }
  0x29   :  { %106 = vrsqrt.f32 %v70_v8  ;;  %vm73_vm0 = vcmp.eq.f32.partialorder %v70_v8, inf  ;;  %v76_v12 = vand.u32 2147483648, %v70_v8  ;;  %vm75_vm1 = vcmp.eq.f32.partialorder %v70_v8, 0.0 }
  0x33   :  { %v107_v11 = vpop.eup %106 }
  0x34   :  { %v72_v14 = vmul.f32 %v107_v11, %v70_v8 }
  0x36   :  { %v74_v16 = vsel %vm73_vm0, %v70_v8, %v72_v14 }
  0x37   :  { %v77_v17 = vsel %vm75_vm1, %v76_v12, %v74_v16 }
  0x38   :  { %v79_v18 = vsub.f32 %v77_v17, %v78_v15 }
  0x3a   :  { %v80_v20 = vmul.f32 %v79_v18, %v79_v18 }
  0x3c   :  { %v82_v21 = vadd.f32 %v81_v19, %v80_v20 }
  0x3e   :  { %108 = vrsqrt.f32 %v82_v21  ;;  %vm85_vm2 = vcmp.eq.f32.partialorder %v82_v21, inf  ;;  %v88_v23 = vand.u32 2147483648, %v82_v21  ;;  %vm87_vm3 = vcmp.eq.f32.partialorder %v82_v21, 0.0 }
  0x48   :  { %v109_v22 = vpop.eup %108 }
  0x49   :  { %v84_v24 = vmul.f32 %v109_v22, %v82_v21 }
  0x4b   :  { %v86_v26 = vsel %vm85_vm2, %v82_v21, %v84_v24 }
  0x4c   :  { %v89_v27 = vsel %vm87_vm3, %v88_v23, %v86_v26 }
  0x4d   :  { %v91_v28 = vsub.f32 %v89_v27, %v90_v25 }
  0x4f   :  { %92 = vst [vmem:[%s181_s3] sm:$0xff] %v91_v28 }
  0x50   :  { %97 = vsyncpa [#allocation3], 1 }
  0x51   :  { %98 = vsyncpa [#allocation5], 1 }

</bundles_post_ra>
